<compile_context>
chip_gen: v7x
topology: tpu7x:2x2x1
jax: 0.10.0
libtpu: 0.0.40
codegen_flags: <defaults>
</compile_context>

<pallas_src>
from functools import partial

import jax
import jax.numpy as jnp
from jax.experimental import pallas as pl
from jax.experimental.pallas import tpu as pltpu

NUM_LAYERS = 24  # fixed by the module: nn.Parameter(torch.zeros(24))


def _fuse_kernel(w_ref, x_ref, o_ref, acc_ref, *, transpose_out,
                 cast_before_transpose):
    """One (tile, layer) step of the weighted layer sum (+ fused permute).

    w_ref:   SMEM (L,)           softmax-normalized layer weights (f32)
    x_ref:   VMEM (1, 1, Tt, Ft) one layer's feature tile, native dtype
    o_ref:   VMEM (1, Ft, Tt)    fused+transposed tile (if transpose_out)
             VMEM (1, Tt, Ft)    fused tile            (otherwise)
    acc_ref: VMEM (Tt, Ft) f32   scratch accumulator, resident across the L axis
    """
    l = pl.program_id(3)

    @pl.when(l == 0)
    def _():
        acc_ref[...] = jnp.zeros_like(acc_ref)

    # Scalar-weight FMA on the VPU; deeply hidden under the HBM roofline.
    acc_ref[...] += w_ref[l] * x_ref[0, 0].astype(jnp.float32)

    @pl.when(l == pl.num_programs(3) - 1)
    def _():
        if transpose_out:
            if cast_before_transpose:
                # Cast first: half the vregs through the XLU, half the temp VMEM.
                o_ref[0] = jnp.transpose(acc_ref[...].astype(o_ref.dtype))
            else:
                o_ref[0] = jnp.transpose(acc_ref[...]).astype(o_ref.dtype)
        else:
            o_ref[0] = acc_ref[...].astype(o_ref.dtype)


def _largest_aligned_divisor(dim, granule, cap):
    """Largest divisor of `dim` that is a multiple of `granule` and <= cap, or None."""
    if dim % granule != 0 or granule > cap:
        return None
    n = dim // granule
    for d in range(n, 0, -1):
        cand = d * granule
        if n % d == 0 and cand <= cap:
            return cand
    return None


def _pick_time_tile(T, cap):
    if T <= cap:
        return T
    # Prefer lane-dense (multiple-of-128) tiles so the fused transpose stays on.
    for granule in (128, 8):
        t = _largest_aligned_divisor(T, granule, cap)
        if t is not None:
            return t
    # TODO(synk): pad large non-8-aligned T instead of using a full-dim block.
    return T


def _pick_feature_tile(F, cap):
    if F <= cap:
        return F
    t = _largest_aligned_divisor(F, 128, cap)
    if t is not None:
        return t
    # TODO(synk): pad large non-128-aligned F instead of using a full-dim block.
    return F


def speaker_model_forward(feature_weight, x_stack, *, out_dtype=None,
                          vmem_budget_bytes=None):
    """feature_weight: (24,) f32; x_stack: (24, B, T, F) -> (B, F, T)."""
    L, B, T, F = x_stack.shape
    assert L == NUM_LAYERS, f"expected {NUM_LAYERS} stacked layers, got {L}"

    if out_dtype is None:
        out_dtype = x_stack.dtype            # keep native dtype (e.g. bf16) end-to-end
    in_bytes = jnp.dtype(x_stack.dtype).itemsize
    out_bytes = jnp.dtype(out_dtype).itemsize

    # --- generation-aware VMEM budget ----------------------------------------
    try:
        vmem_capacity = int(pltpu.get_tpu_info().vmem_capacity_bytes)
    except Exception:                         # info query unavailable -> assume 128 MiB
        vmem_capacity = 128 * 1024 * 1024
    if vmem_capacity <= 64 * 1024 * 1024:     # v7x: 64 MiB per TensorCore
        blk_cap, vmem_ceiling = 24 * 1024 * 1024, 40 * 1024 * 1024
    else:                                     # v5e / v6e: 128 MiB
        blk_cap, vmem_ceiling = 48 * 1024 * 1024, 96 * 1024 * 1024
    if vmem_budget_bytes is None:
        vmem_budget_bytes = blk_cap
    budget = min(int(vmem_budget_bytes), blk_cap)

    # Per-element VMEM cost of one (Tt, Ft) tile:
    #   2x double-buffered input + 2x double-buffered output
    #   + f32 accumulator scratch + transpose temporary (counted conservatively).
    per_elem = 2 * in_bytes + 2 * out_bytes + 4 + out_bytes
    elem_budget = max(8 * 128, budget // per_elem)

    # --- tile selection: contiguous per-layer DMAs (Ft = F preferred) --------
    Ft = _pick_feature_tile(F, max(128, elem_budget // 8))
    Tt = _pick_time_tile(T, max(8, elem_budget // Ft))

    blk_bytes = Tt * Ft * per_elem
    if blk_bytes > blk_cap + 8 * 1024 * 1024:
        raise ValueError(
            f"Tile (Tt={Tt}, Ft={Ft}) needs ~{blk_bytes >> 20} MiB of pipelined VMEM "
            f"(cap ~{blk_cap >> 20} MiB on this TPU); pad T={T} / F={F} to a multiple "
            f"of 128 or lower vmem_budget_bytes.")
    vmem_limit = min(vmem_ceiling, max(32 * 1024 * 1024, blk_bytes + 8 * 1024 * 1024))

    # Softmax hoisted out of the per-tile loop (linear contraction => identical).
    norm_w = jax.nn.softmax(feature_weight.astype(jnp.float32), axis=-1)

    # Fuse permute(0,2,1) in-kernel only when the transposed out block (1, Ft, Tt)
    # is legal AND lane-dense: Tt is its lane dim, so Tt < 128 would mean masked
    # partial stores (the single biggest out-spec penalty) — fall back then.
    sub_gran = 8 if out_bytes >= 4 else 16
    fuse_permute = (Tt >= 128
                    and (Tt % 128 == 0 or Tt == T)
                    and (Ft % sub_gran == 0 or Ft == F))
    cast_before_transpose = (out_bytes >= 4) or (Tt % 16 == 0 and Ft % 16 == 0)

    grid = (B, T // Tt, F // Ft, L)   # L innermost: in-grid reduction (pattern P3)
    if fuse_permute:
        out_shape = jax.ShapeDtypeStruct((B, F, T), out_dtype)
        out_spec = pl.BlockSpec((1, Ft, Tt), lambda b, ti, fi, l, w: (b, fi, ti))
    else:
        out_shape = jax.ShapeDtypeStruct((B, T, F), out_dtype)
        out_spec = pl.BlockSpec((1, Tt, Ft), lambda b, ti, fi, l, w: (b, ti, fi))

    cost = pl.CostEstimate(
        flops=2 * L * B * T * F,
        transcendentals=0,
        bytes_accessed=L * B * T * F * in_bytes + B * T * F * out_bytes + L * 4,
    )

    fused = pl.pallas_call(
        partial(_fuse_kernel, transpose_out=fuse_permute,
                cast_before_transpose=cast_before_transpose),
        out_shape=out_shape,
        grid_spec=pltpu.PrefetchScalarGridSpec(
            num_scalar_prefetch=1,            # norm_w -> SMEM, once, before the grid
            grid=grid,
            in_specs=[
                # One layer's (Tt, Ft) tile per step: with Ft == F this is a single
                # contiguous HBM run of Tt*F elements (row-major (L,B,T,F)).
                pl.BlockSpec((1, 1, Tt, Ft), lambda b, ti, fi, l, w: (l, b, ti, fi)),
            ],
            out_specs=out_spec,
            scratch_shapes=[pltpu.VMEM((Tt, Ft), jnp.float32)],
        ),
        compiler_params=pltpu.CompilerParams(
            dimension_semantics=("parallel", "parallel", "parallel", "arbitrary"),
            vmem_limit_bytes=int(vmem_limit),
        ),
        cost_estimate=cost,
    )(norm_w, x_stack)

    if not fuse_permute:
        # Fallback for lane-sparse / transpose-unfriendly tiles: permute in XLA.
        fused = fused.transpose(0, 2, 1)
    return fused


def _reference_forward(feature_weight, x_stack):
    """Pure-JAX reference of the same math (for correctness check)."""
    w = jax.nn.softmax(feature_weight.astype(jnp.float32), axis=-1)
    fused = jnp.tensordot(w, x_stack.astype(jnp.float32), axes=([0], [0]))  # (B,T,F)
    return fused.transpose(0, 2, 1)                                          # (B,F,T)


if __name__ == "__main__":
    key = jax.random.PRNGKey(0)
    k_w, k_x = jax.random.split(key)

    # Small, module-consistent, TPU-tile-friendly shapes:
    # 24 WavLM layers, batch=2, seq(T)=128 frames, feat_dim(F)=256.
    B, T, F = 2, 128, 256
    # Module init is torch.zeros(24); use a small deterministic random init so
    # the softmax weighting is exercised non-trivially.
    feature_weight = 0.1 * jax.random.normal(k_w, (NUM_LAYERS,), dtype=jnp.float32)
    x_stack = jax.random.normal(k_x, (NUM_LAYERS, B, T, F), dtype=jnp.float32)

    out = speaker_model_forward(feature_weight, x_stack)
    out = jax.block_until_ready(out)

    ref = _reference_forward(feature_weight, x_stack)
    assert out.shape == (B, F, T), out.shape
    assert jnp.allclose(out, ref, atol=1e-5, rtol=1e-5), "mismatch vs reference"

    print("KERNEL_OK")
</pallas_src>

<mosaic_0001>
module attributes {stable_mosaic.version = 11 : i64} {
  func.func @_fuse_kernel(%arg0: i32, %arg1: i32, %arg2: i32, %arg3: i32, %arg4: memref<24xf32, #tpu.memory_space<smem>>, %arg5: memref<1x1x128x256xf32, #tpu.memory_space<vmem>>, %arg6: memref<1x256x128xf32, #tpu.memory_space<vmem>>, %arg7: memref<128x256xf32, #tpu.memory_space<vmem>>) attributes {dimension_semantics = [#tpu.dimension_semantics<parallel>, #tpu.dimension_semantics<parallel>, #tpu.dimension_semantics<parallel>, #tpu.dimension_semantics<arbitrary>], iteration_bounds = array<i64: 2, 1, 1, 24>, scalar_prefetch = 1 : i64, scratch_operands = 1 : i64, tpu.core_type = #tpu.core_type<tc>, window_params = [{transform_indices = @transform_0, window_bounds = array<i64: 1, 1, 128, 256>}, {transform_indices = @transform_1, window_bounds = array<i64: 1, 256, 128>}]} {
    %c0_i32 = arith.constant 0 : i32
    %0 = arith.cmpi eq, %arg3, %c0_i32 : i32
    %1 = arith.extui %0 : i1 to i32
    %c0_i32_0 = arith.constant 0 : i32
    %2 = arith.cmpi ne, %1, %c0_i32_0 : i32
    scf.if %2 {
      %cst = arith.constant 0.000000e+00 : f32
      %15 = vector.broadcast %cst : f32 to vector<128x256xf32>
      %c0_9 = arith.constant 0 : index
      %c0_10 = arith.constant 0 : index
      %16 = vector.load %arg7[%c0_9, %c0_10] : memref<128x256xf32, #tpu.memory_space<vmem>>, vector<128x256xf32>
      tpu.vector_store %arg7[%c0_9, %c0_10], %15 {strides = array<i32>} : memref<128x256xf32, #tpu.memory_space<vmem>>, vector<128x256xf32>,
    } else {
    }
    %c0 = arith.constant 0 : index
    %c0_1 = arith.constant 0 : index
    %3 = vector.load %arg7[%c0, %c0_1] : memref<128x256xf32, #tpu.memory_space<vmem>>, vector<128x256xf32>
    %4 = arith.index_cast %arg3 : i32 to index
    %5 = memref.load %arg4[%4] : memref<24xf32, #tpu.memory_space<smem>>
    %c0_2 = arith.constant 0 : index
    %c0_3 = arith.constant 0 : index
    %c0_4 = arith.constant 0 : index
    %c0_5 = arith.constant 0 : index
    %6 = vector.load %arg5[%c0_2, %c0_3, %c0_4, %c0_5] : memref<1x1x128x256xf32, #tpu.memory_space<vmem>>, vector<1x1x128x256xf32>
    %7 = vector.shape_cast %6 : vector<1x1x128x256xf32> to vector<128x256xf32>
    %8 = vector.broadcast %5 : f32 to vector<128x256xf32>
    %9 = arith.mulf %8, %7 : vector<128x256xf32>
    %10 = arith.addf %3, %9 : vector<128x256xf32>
    %c0_6 = arith.constant 0 : index
    %c0_7 = arith.constant 0 : index
    %11 = vector.load %arg7[%c0_6, %c0_7] : memref<128x256xf32, #tpu.memory_space<vmem>>, vector<128x256xf32>
    tpu.vector_store %arg7[%c0_6, %c0_7], %10 {strides = array<i32>} : memref<128x256xf32, #tpu.memory_space<vmem>>, vector<128x256xf32>,
    %c23_i32 = arith.constant 23 : i32
    %12 = arith.cmpi eq, %arg3, %c23_i32 : i32
    %13 = arith.extui %12 : i1 to i32
    %c0_i32_8 = arith.constant 0 : i32
    %14 = arith.cmpi ne, %13, %c0_i32_8 : i32
    scf.if %14 {
      %c0_9 = arith.constant 0 : index
      %c0_10 = arith.constant 0 : index
      %15 = vector.load %arg7[%c0_9, %c0_10] : memref<128x256xf32, #tpu.memory_space<vmem>>, vector<128x256xf32>
      %16 = tpu.transpose %15, [1, 0] : vector<128x256xf32> -> vector<256x128xf32>
      %c0_11 = arith.constant 0 : index
      %c0_12 = arith.constant 0 : index
      %c0_13 = arith.constant 0 : index
      %17 = vector.load %arg6[%c0_11, %c0_12, %c0_13] : memref<1x256x128xf32, #tpu.memory_space<vmem>>, vector<1x256x128xf32>
      %18 = vector.shape_cast %17 : vector<1x256x128xf32> to vector<256x128xf32>
      %19 = vector.shape_cast %16 : vector<256x128xf32> to vector<1x256x128xf32>
      tpu.vector_store %arg6[%c0_11, %c0_12, %c0_13], %19 {strides = array<i32>} : memref<1x256x128xf32, #tpu.memory_space<vmem>>, vector<1x256x128xf32>,
    } else {
    }
    return
  }
  func.func @transform_0(%arg0: i32, %arg1: i32, %arg2: i32, %arg3: i32, %arg4: memref<24xf32, #tpu.memory_space<smem>>) -> (i32, i32, i32, i32) {
    %c0_i32 = arith.constant 0 : i32
    return %arg3, %arg0, %arg1, %arg2 : i32, i32, i32, i32
  }
  func.func @transform_1(%arg0: i32, %arg1: i32, %arg2: i32, %arg3: i32, %arg4: memref<24xf32, #tpu.memory_space<smem>>) -> (i32, i32, i32) {
    %c0_i32 = arith.constant 0 : i32
    return %arg0, %arg2, %arg1 : i32, i32, i32
  }
}

</mosaic_0001>

<bundles_post_ra>
// kernel: tpu_custom_call.1
= control target key start
LH: loop header
LB: loop body
LE: loop exit
PB: predicated region body
PF: predicated region fallthrough
CT: control target
= control target key end

     0   :  { %s1292_s0 = inlined_call_operand.hbm [shape: f32[24], index: 0, kind: input, shape index: {}]   ;;  %s1293_s1 = inlined_call_operand.hbm [shape: f32[24,2,128,256], index: 1, kind: input, shape index: {}]   ;;  %s1294_s2 = inlined_call_operand.hbm [shape: f32[2,256,128], index: 2, kind: output, shape index: {}]  }
   0x1   :  { %s761_s11 = scalar_lea.hbm %s1292_s0, 16 }
   0x2   :  { %p762_p0 = scmp.ne.s32.totalorder %s1292_s0, %s761_s11  ;;  %p765_p1 = scmp.lt.u32.totalorder %s761_s11, %s1292_s0 }
   0x4   :  { %p767_p2 = pnand %p765_p1, %p762_p0 }
   0x6   :  { %770 = shalt.err (!%p767_p2)  }
   0x7   :  { %s927_s16 = smov [#allocation4]  }
   0x8   :  { %8 = dma.hbm_to_smem %s1292_s0, 16, %s927_s16, [#allocation3] }
   0x9   :  { %873 = dma.done.wait [#allocation3], 16 }
   0xa   :  { %874 = vsyncadd [#allocation3], 4294967280 }
   0xb   :  { %10 = sfence }
   0xc   :  { %11 = vsyncpa [#allocation6], 0 }
   0xd   :  { %13 = vsyncpa [#allocation6 + $0x1], 0 }
   0xe   :  { %14 = vsyncpa [#allocation7], 0 }
   0xf   :  { %16 = vsyncpa [#allocation7 + $0x1], 0  ;;  %s962_s19 = smov 0   ;;  %s964_s20 = smov 0  }
  0x10   :  { %s966_s21 = smov 0   ;;  %s968_s22 = smov 0  }
  0x11   :  { %s970_s23 = smov 0   ;;  %s972_s24 = smov 0  }
  0x12   :  { %s974_s0 = smov 0   ;;  %s976_s25 = smov 0  }
  0x13   :  { %s978_s26 = smov 0   ;;  %s980_s27 = smov 0  }
  0x14   :  { %s982_s28 = smov 0  }
  0x15 LB: > { %s634_s29 = sadd.s32 4294967295, %s925_s28   ;;  %s635_s30 = sadd.s32 4294967294, %s925_s28   ;;  %s925_s28 = sphi %s982_s28, %s22_s28   ;;  %s921_s27 = sphi %s980_s27, %s1315_s27   ;;  %s917_s26 = sphi %s978_s26, %s1314_s26   ;;  %s913_s25 = sphi %s976_s25, %s1313_s25   ;;  %s909_s0 = sphi %s974_s0, %s1312_s0   ;;  %s905_s24 = sphi %s972_s24, %s1311_s24   ;;  %s901_s23 = sphi %s970_s23, %s1310_s23   ;;  %s897_s22 = sphi %s968_s22, %s1309_s22   ;;  %s893_s21 = sphi %s966_s21, %s1308_s21   ;;  %s889_s20 = sphi %s964_s20, %s1307_s20   ;;  %s885_s19 = sphi %s962_s19, %s1306_s19  }
  0x16   : > { %s37_s3 = sadd.s32 1, %s917_s26  ;;  %s48_s4 = sadd.s32 1, %s921_s27 }
  0x17   : > { %p38_p3 = scmp.ge.s32.totalorder %s37_s3, 24  ;;  %s61_s5 = sadd.s32 1, %s905_s24 }
  0x18   : > { %p68_p4 = scmp.ne.s32.totalorder %s905_s24, %s901_s23  ;;  %p69_p5 = scmp.eq.s32.totalorder %s925_s28, 0 }
  0x19   : > { %s1317_s3 = smov (%p38_p3, %s37_s3), 0  ;;  %s1319_s4 = smov (!%p38_p3, %s48_s4), %s921_s27 }
  0x1a   : > { %s52_s6 = ssub.s32 %s917_s26, %s1317_s3  ;;  %p1028_p6 = por %p69_p5, %p68_p4 }
  0x1b   : > { %p50_p7 = scmp.ge.s32.totalorder %s1319_s4, 2  ;;  %p74_p8 = scmp.ne.s32.totalorder %s901_s23, %s897_s22 }
  0x1c   : > { %p75_p9 = scmp.eq.s32.totalorder %s634_s29, 0  ;;  %s91_s8 = sadd.s32 1, %s893_s21 }
  0x1d   : > { %s1321_s4 = smov (%p50_p7, %s1319_s4), 0  ;;  %p101_p11 = scmp.ne.s32.totalorder %s893_s21, %s889_s20 }
  0x1e   : > { %1298 = sst [smem:[#allocation12_spill]] %s1321_s4  ;;  %p1036_p10 = por %p75_p9, %p74_p8 }
  0x1f   : > { %s53_s10 = ssub.s32 %s921_s27, %s1321_s4  ;;  %p102_p12 = scmp.eq.s32.totalorder %s634_s29, 47 }
  0x20   : > { %s54_s11 = sor.u32 %s53_s10, %s52_s6  ;;  %p89_p13 = scmp.eq.s32.totalorder %s53_s10, 0 }
  0x21   : > { %p59_p0 = scmp.eq.s32.totalorder %s54_s11, 0  ;;  %p1044_p1 = por %p102_p12, %p101_p11 }
  0x22   : > { %s1049_s13 = scalar_select %p89_p13, %s893_s21, %s91_s8  }
  0x23   : > { %s1300_s12 = scalar_select %p1044_p1, 1, 0 }
  0x24   : > { %s1052_s14 = scalar_select %p59_p0, %s905_s24, %s61_s5  }
  0x25   : > { %p107_p2 = scmp.ne.s32.totalorder %s889_s20, %s885_s19  ;;  %p108_p3 = scmp.eq.s32.totalorder %s635_s30, 47 }
  0x26   : > { %p665_p4 = scmp.lt.s32.totalorder %s925_s28, 48  ;;  %s128_s16 = sand.u32 1, %s905_s24  }
  0x27   : > { %p1057_p5 = por %p108_p3, %p107_p2  ;;  %s638_s17 = sshll.u32 %s128_s16, 8 }
  0x28   : > { %s639_s18 = sshll.u32 %s921_s27, 5  ;;  %s640_s22 = sshll.u32 %s917_s26, 6 }
  0x29   : > { %s1301_s15 = scalar_select %p1057_p5, 1, 0 }
  0x2a   : > { %s132_s29 = scalar_lea.vmem [#allocation5], %s638_s17  ;;  %s143_s10 = sadd.s32 %s640_s22, %s639_s18 }
  0x2b   : > { %s146_s6 = sshll.u32 %s132_s29, 4  ;;  %s641_s8 = sshll.u32 %s143_s10, 7  ;;  %s1064_s6 = int_to_ptr.vmem [resolvable:$true] %s146_s6 }
  0x2c   : > { %p1068_p7 = pnand %p665_p4, %p1028_p6  ;;  %s1075_s4 = scalar_lea.hbm %s1293_s1, %s641_s8 }
  0x2d   : > { %s1077_s17 = scalar_lea.sflag [#allocation6], %s128_s16  ;;  %s771_s18 = scalar_lea.hbm %s1075_s4, 4096 }
  0x2e   : > { %p772_p8 = scmp.ne.s32.totalorder %s1075_s4, %s771_s18  ;;  %p773_p6 = pneg %p1068_p7 }
  0x2f   : > { %s776_s29 = scalar_lea.hbm %s1293_s1, 196608  ;;  %p777_p12 = scmp.lt.u32.totalorder %s1075_s4, %s1293_s1 }
  0x30   : > { %p774_p9 = pnand %p773_p6, %p772_p8  ;;  %p778_p13 = scmp.lt.u32.totalorder %s776_s29, %s771_s18 }
  0x31   : > { %p780_p2 = scmp.lt.u32.totalorder %s771_s18, %s1075_s4 }
  0x32   : > { %p775_p11 = pneg %p774_p9  ;;  %p779_p0 = por %p778_p13, %p777_p12 }
  0x34   : > { %p781_p3 = por %p780_p2, %p779_p0 }
  0x36   : > { %p782_p4 = pnand %p781_p3, %p775_p11 }
  0x38   : > { %785 = shalt.err (!%p782_p4)
}
  0x39   : > { %s786_s16 = scalar_lea.vmem %s1064_s6, 4096  ;;  %s928_s30 = smov [#allocation5]  }
  0x3a   : > { %p787_p8 = scmp.ne.s32.totalorder %s1064_s6, %s786_s16  ;;  %s791_s11 = sshll.u32 %s928_s30, 4  ;;  %s792_s11 = int_to_ptr.vmem [resolvable:$false] %s791_s11 }
  0x3b   : > { %s793_s7 = scalar_lea.vmem %s792_s11, 8192  ;;  %p794_p1 = scmp.lt.s32.totalorder %s1064_s6, %s792_s11 }
  0x3c   : > { %p789_p9 = pnand %p787_p8, %p773_p6  ;;  %p795_p12 = scmp.lt.s32.totalorder %s793_s7, %s786_s16 }
  0x3e   : > { %p790_p5 = pneg %p789_p9  ;;  %p796_p13 = por %p795_p12, %p794_p1 }
  0x40   : > { %p797_p0 = pnand %p796_p13, %p790_p5 }
  0x42   : > { %800 = shalt.err (!%p797_p0)
}
  0x43   : > { %s929_s18 = smov 256   ;;  %s930_s22 = smov 16  }
  0x44   : > { %660 = dma.hbm_to_vmem [thread:$0]  (!%p1068_p7), %s1075_s4, 4096, %s1064_s6, %s1077_s17, %s929_s18, %s929_s18, %s930_s22  }
  0x45   : > { %p642_p6 = scmp.ge.s32.totalorder %s925_s28, 1  ;;  %p154_p11 = scmp.lt.s32.totalorder %s925_s28, 49 }
  0x47   : > { %p155_p2 = pnand %p642_p6, %p154_p11 }
  0x48   : > { %s160_s29 = sand.u32 (!%p155_p2), 1, %s901_s23  }
  0x49   : > { %158 = sbr.rel (%p155_p2) target bundleno = 341 (0x155), region = 24  ;;  %s643_s10 = sshll.u32 (!%p155_p2), %s160_s29, 8 }
  0x4a   : > { %s161_s8 = scalar_lea.sflag (!%p155_p2), [#allocation6], %s160_s29  ;;  %s1108_s16 = scalar_lea.vmem (!%p155_p2), [#allocation5], %s643_s10 }
  0x50   : > { %876 = dma.done.wait (%p1036_p10), %s161_s8, 4096  }
  0x51   : > { %878 = vsyncadd (%p1036_p10), %s161_s8, 4294963200  ;;  %s180_s5 = sand.u32 1, %s889_s20   ;;  %p645_p1 = scmp.ne.s32.totalorder %s909_s0, 0 }
  0x52   : > { %s644_s4 = sshll.u32 %s180_s5, 8  ;;  %v931_v0 = vmov (!%p645_p1), 0.0  }
  0x53   : > { %s1117_s6 = scalar_lea.vmem [#allocation8], %s644_s4  ;;  %189 = sbr.rel (%p645_p1) target bundleno = 99 (0x63), region = 32  ;;  %190 = vst [vmem:[#allocation2] sm:$0xff] (!%p645_p1), %v931_v0  ;;  %191 = vst [vmem:[#allocation2 + $0x8] sm:$0xff] (!%p645_p1), %v931_v0 }
  0x54   : > { %192 = vst [vmem:[#allocation2 + $0x10] sm:$0xff] (!%p645_p1), %v931_v0  ;;  %193 = vst [vmem:[#allocation2 + $0x18] sm:$0xff] (!%p645_p1), %v931_v0 }
  0x55   : > { %194 = vst [vmem:[#allocation2 + $0x20] sm:$0xff] (!%p645_p1), %v931_v0  ;;  %195 = vst [vmem:[#allocation2 + $0x28] sm:$0xff] (!%p645_p1), %v931_v0 }
  0x56   : > { %196 = vst [vmem:[#allocation2 + $0x30] sm:$0xff] (!%p645_p1), %v931_v0  ;;  %197 = vst [vmem:[#allocation2 + $0x38] sm:$0xff] (!%p645_p1), %v931_v0 }
  0x57   : > { %198 = vst [vmem:[#allocation2 + $0x40] sm:$0xff] (!%p645_p1), %v931_v0  ;;  %199 = vst [vmem:[#allocation2 + $0x48] sm:$0xff] (!%p645_p1), %v931_v0 }
  0x58   : > { %200 = vst [vmem:[#allocation2 + $0x50] sm:$0xff] (!%p645_p1), %v931_v0  ;;  %201 = vst [vmem:[#allocation2 + $0x58] sm:$0xff] (!%p645_p1), %v931_v0 }
  0x59   : > { %202 = vst [vmem:[#allocation2 + $0x60] sm:$0xff] (!%p645_p1), %v931_v0  ;;  %203 = vst [vmem:[#allocation2 + $0x68] sm:$0xff] (!%p645_p1), %v931_v0 }
  0x5a   : > { %204 = vst [vmem:[#allocation2 + $0x70] sm:$0xff] %v931_v0  ;;  %205 = vst [vmem:[#allocation2 + $0x78] sm:$0xff] %v931_v0 }
  0x5b   : > { %206 = vst [vmem:[#allocation2 + $0x80] sm:$0xff] %v931_v0  ;;  %207 = vst [vmem:[#allocation2 + $0x88] sm:$0xff] %v931_v0 }
  0x5c   : > { %208 = vst [vmem:[#allocation2 + $0x90] sm:$0xff] %v931_v0  ;;  %209 = vst [vmem:[#allocation2 + $0x98] sm:$0xff] %v931_v0 }
  0x5d   : > { %210 = vst [vmem:[#allocation2 + $0xa0] sm:$0xff] %v931_v0  ;;  %211 = vst [vmem:[#allocation2 + $0xa8] sm:$0xff] %v931_v0 }
  0x5e   : > { %212 = vst [vmem:[#allocation2 + $0xb0] sm:$0xff] %v931_v0  ;;  %213 = vst [vmem:[#allocation2 + $0xb8] sm:$0xff] %v931_v0 }
  0x5f   : > { %214 = vst [vmem:[#allocation2 + $0xc0] sm:$0xff] %v931_v0  ;;  %215 = vst [vmem:[#allocation2 + $0xc8] sm:$0xff] %v931_v0 }
  0x60   : > { %216 = vst [vmem:[#allocation2 + $0xd0] sm:$0xff] %v931_v0  ;;  %217 = vst [vmem:[#allocation2 + $0xd8] sm:$0xff] %v931_v0 }
  0x61   : > { %218 = vst [vmem:[#allocation2 + $0xe0] sm:$0xff] %v931_v0  ;;  %219 = vst [vmem:[#allocation2 + $0xe8] sm:$0xff] %v931_v0 }
  0x62   : > { %220 = vst [vmem:[#allocation2 + $0xf0] sm:$0xff] %v931_v0  ;;  %221 = vst [vmem:[#allocation2 + $0xf8] sm:$0xff] %v931_v0 }
  0x63 PF: > { %s254_s9 = sld [smem:[#allocation4 + %s909_s0]]  ;;  %v255_v1 = vld [vmem:[%s1108_s16] sm:$0xff]  ;;  %v256_v2 = vld [vmem:[%s1108_s16 + $0x8] sm:$0xff]  ;;  %v257_v3 = vld [vmem:[%s1108_s16 + $0x10] sm:$0xff]  ;;  %p646_p10 = scmp.ne.s32.totalorder %s909_s0, 23 }
  0x64   : > { %v222_v4 = vld [vmem:[#allocation2] sm:$0xff]  ;;  %v223_v5 = vld [vmem:[#allocation2 + $0x8] sm:$0xff]  ;;  %v224_v6 = vld [vmem:[#allocation2 + $0x10] sm:$0xff] }
  0x65   : > { %v225_v7 = vld [vmem:[#allocation2 + $0x18] sm:$0xff]  ;;  %v259_v9 = vld [vmem:[%s1108_s16 + $0x20] sm:$0xff]  ;;  %v260_v10 = vld [vmem:[%s1108_s16 + $0x28] sm:$0xff] }
  0x66   : > { %v258_v8 = vld [vmem:[%s1108_s16 + $0x18] sm:$0xff]  ;;  %v261_v11 = vld [vmem:[%s1108_s16 + $0x30] sm:$0xff]  ;;  %v226_v14 = vld [vmem:[#allocation2 + $0x20] sm:$0xff] }
  0x67   : > { %v262_v12 = vld [vmem:[%s1108_s16 + $0x38] sm:$0xff]  ;;  %v227_v15 = vld [vmem:[#allocation2 + $0x28] sm:$0xff]  ;;  %v228_v16 = vld [vmem:[#allocation2 + $0x30] sm:$0xff] }
  0x68   : > { %v229_v21 = vld [vmem:[#allocation2 + $0x38] sm:$0xff]  ;;  %v263_v22 = vld [vmem:[%s1108_s16 + $0x40] sm:$0xff]  ;;  %v264_v23 = vld [vmem:[%s1108_s16 + $0x48] sm:$0xff] }
  0x69   : > { %v1129_v13 = vstv %s254_s9  ;;  %v230_v28 = vld [vmem:[#allocation2 + $0x40] sm:$0xff]  ;;  %v231_v29 = vld [vmem:[#allocation2 + $0x48] sm:$0xff]  ;;  %v232_v30 = vld [vmem:[#allocation2 + $0x50] sm:$0xff] }
  0x6a   : > { %v288_v17 = vmul.f32 %v1129_v13, %v255_v1  ;;  %v289_v18 = vmul.f32 %v1129_v13, %v256_v2  ;;  %v290_v19 = vmul.f32 %v1129_v13, %v257_v3  ;;  %v291_v20 = vmul.f32 %v1129_v13, %v258_v8  ;;  %v265_v31 = vld [vmem:[%s1108_s16 + $0x50] sm:$0xff]  ;;  %v233_v32 = vld [vmem:[#allocation2 + $0x58] sm:$0xff]  ;;  %v234_v38 = vld [vmem:[#allocation2 + $0x60] sm:$0xff] }
  0x6b   : > { %v292_v24 = vmul.f32 %v1129_v13, %v259_v9  ;;  %v293_v25 = vmul.f32 %v1129_v13, %v260_v10  ;;  %v294_v26 = vmul.f32 %v1129_v13, %v261_v11  ;;  %v295_v27 = vmul.f32 %v1129_v13, %v262_v12  ;;  %v266_v33 = vld [vmem:[%s1108_s16 + $0x58] sm:$0xff]  ;;  %v267_v39 = vld [vmem:[%s1108_s16 + $0x60] sm:$0xff]  ;;  %v268_v40 = vld [vmem:[%s1108_s16 + $0x68] sm:$0xff] }
  0x6c   : > { %v320_v34 = vadd.f32 %v288_v17, %v222_v4  ;;  %v321_v35 = vadd.f32 %v289_v18, %v223_v5  ;;  %v322_v36 = vadd.f32 %v290_v19, %v224_v6  ;;  %v323_v37 = vadd.f32 %v291_v20, %v225_v7  ;;  %v269_v41 = vld [vmem:[%s1108_s16 + $0x70] sm:$0xff]  ;;  %v235_v46 = vld [vmem:[#allocation2 + $0x68] sm:$0xff]  ;;  %v270_v48 = vld [vmem:[%s1108_s16 + $0x78] sm:$0xff] }
  0x6d   : > { %v324_v42 = vadd.f32 %v292_v24, %v226_v14  ;;  %v325_v43 = vadd.f32 %v293_v25, %v227_v15  ;;  %v326_v44 = vadd.f32 %v294_v26, %v228_v16  ;;  %v327_v45 = vadd.f32 %v295_v27, %v229_v21  ;;  %v236_v47 = vld [vmem:[#allocation2 + $0x70] sm:$0xff]  ;;  %v237_v53 = vld [vmem:[#allocation2 + $0x78] sm:$0xff]  ;;  %v271_v54 = vld [vmem:[%s1108_s16 + $0x80] sm:$0xff] }
  0x6e   : > { %352 = vst [vmem:[#allocation2] sm:$0xff] %v320_v34  ;;  %353 = vst [vmem:[#allocation2 + $0x8] sm:$0xff] %v321_v35  ;;  %v296_v49 = vmul.f32 %v1129_v13, %v263_v22  ;;  %v297_v50 = vmul.f32 %v1129_v13, %v264_v23  ;;  %v298_v51 = vmul.f32 %v1129_v13, %v265_v31  ;;  %v272_v55 = vld [vmem:[%s1108_s16 + $0x88] sm:$0xff]  ;;  %v238_v60 = vld [vmem:[#allocation2 + $0x80] sm:$0xff] }
  0x6f   : > { %354 = vst [vmem:[#allocation2 + $0x10] sm:$0xff] %v322_v36  ;;  %355 = vst [vmem:[#allocation2 + $0x18] sm:$0xff] %v323_v37  ;;  %v299_v52 = vmul.f32 %v1129_v13, %v266_v33  ;;  %v300_v56 = vmul.f32 %v1129_v13, %v267_v39  ;;  %v301_v57 = vmul.f32 %v1129_v13, %v268_v40  ;;  %v239_v61 = vld [vmem:[#allocation2 + $0x88] sm:$0xff]  ;;  %v240_v62 = vld [vmem:[#allocation2 + $0x90] sm:$0xff] }
  0x70   : > { %356 = vst [vmem:[#allocation2 + $0x20] sm:$0xff] %v324_v42  ;;  %357 = vst [vmem:[#allocation2 + $0x28] sm:$0xff] %v325_v43  ;;  %v302_v58 = vmul.f32 %v1129_v13, %v269_v41  ;;  %v303_v59 = vmul.f32 %v1129_v13, %v270_v48  ;;  %v273_v63 = vld [vmem:[%s1108_s16 + $0x90] sm:$0xff]  ;;  %v241_v0 = vld [vmem:[#allocation2 + $0x98] sm:$0xff]  ;;  %v328_v1 = vadd.f32 %v296_v49, %v230_v28 }
  0x71   : > { %358 = vst [vmem:[#allocation2 + $0x30] sm:$0xff] %v326_v44  ;;  %359 = vst [vmem:[#allocation2 + $0x38] sm:$0xff] %v327_v45  ;;  %v329_v2 = vadd.f32 %v297_v50, %v231_v29  ;;  %v330_v3 = vadd.f32 %v298_v51, %v232_v30  ;;  %v331_v4 = vadd.f32 %v299_v52, %v233_v32  ;;  %v274_v5 = vld [vmem:[%s1108_s16 + $0x98] sm:$0xff]  ;;  %v242_v6 = vld [vmem:[#allocation2 + $0xa0] sm:$0xff] }
  0x72   : > { %v275_v7 = vld [vmem:[%s1108_s16 + $0xa0] sm:$0xff]  ;;  %v332_v8 = vadd.f32 %v300_v56, %v234_v38  ;;  %v333_v9 = vadd.f32 %v301_v57, %v235_v46  ;;  %v334_v10 = vadd.f32 %v302_v58, %v236_v47  ;;  %v335_v11 = vadd.f32 %v303_v59, %v237_v53  ;;  %v243_v12 = vld [vmem:[#allocation2 + $0xa8] sm:$0xff]  ;;  %v244_v15 = vld [vmem:[#allocation2 + $0xb0] sm:$0xff]  ;;  %360 = vst [vmem:[#allocation2 + $0x40] sm:$0xff] %v328_v1 }
  0x73   : > { %v276_v14 = vld [vmem:[%s1108_s16 + $0xa8] sm:$0xff]  ;;  %361 = vst [vmem:[#allocation2 + $0x48] sm:$0xff] %v329_v2  ;;  %362 = vst [vmem:[#allocation2 + $0x50] sm:$0xff] %v330_v3  ;;  %v304_v16 = vmul.f32 %v1129_v13, %v271_v54  ;;  %v305_v17 = vmul.f32 %v1129_v13, %v272_v55  ;;  %v306_v18 = vmul.f32 %v1129_v13, %v273_v63  ;;  %v277_v20 = vld [vmem:[%s1108_s16 + $0xb0] sm:$0xff] }
  0x74   : > { %363 = vst [vmem:[#allocation2 + $0x58] sm:$0xff] %v331_v4  ;;  %v307_v19 = vmul.f32 %v1129_v13, %v274_v5  ;;  %v245_v21 = vld [vmem:[#allocation2 + $0xb8] sm:$0xff]  ;;  %364 = vst [vmem:[#allocation2 + $0x60] sm:$0xff] %v332_v8  ;;  %v308_v23 = vmul.f32 %v1129_v13, %v275_v7  ;;  %v309_v24 = vmul.f32 %v1129_v13, %v276_v14  ;;  %v246_v27 = vld [vmem:[#allocation2 + $0xc0] sm:$0xff] }
  0x75   : > { %v278_v22 = vld [vmem:[%s1108_s16 + $0xb8] sm:$0xff]  ;;  %365 = vst [vmem:[#allocation2 + $0x68] sm:$0xff] %v333_v9  ;;  %366 = vst [vmem:[#allocation2 + $0x70] sm:$0xff] %v334_v10  ;;  %v310_v25 = vmul.f32 %v1129_v13, %v277_v20  ;;  %v279_v28 = vld [vmem:[%s1108_s16 + $0xc0] sm:$0xff]  ;;  %v336_v30 = vadd.f32 %v304_v16, %v238_v60  ;;  %v337_v31 = vadd.f32 %v305_v17, %v239_v61 }
  0x76   : > { %367 = vst [vmem:[#allocation2 + $0x78] sm:$0xff] %v335_v11  ;;  %v311_v26 = vmul.f32 %v1129_v13, %v278_v22  ;;  %v247_v29 = vld [vmem:[#allocation2 + $0xc8] sm:$0xff]  ;;  %v338_v32 = vadd.f32 %v306_v18, %v240_v62  ;;  %v339_v33 = vadd.f32 %v307_v19, %v241_v0  ;;  %v248_v35 = vld [vmem:[#allocation2 + $0xd0] sm:$0xff]  ;;  %v340_v37 = vadd.f32 %v308_v23, %v242_v6  ;;  %v249_v41 = vld [vmem:[#allocation2 + $0xd8] sm:$0xff] }
  0x77   : > { %v280_v34 = vld [vmem:[%s1108_s16 + $0xc8] sm:$0xff]  ;;  %v281_v36 = vld [vmem:[%s1108_s16 + $0xd0] sm:$0xff]  ;;  %v341_v38 = vadd.f32 %v309_v24, %v243_v12  ;;  %v342_v39 = vadd.f32 %v310_v25, %v244_v15  ;;  %v282_v42 = vld [vmem:[%s1108_s16 + $0xd8] sm:$0xff]  ;;  %368 = vst [vmem:[#allocation2 + $0x80] sm:$0xff] %v336_v30  ;;  %v312_v44 = vmul.f32 %v1129_v13, %v279_v28 }
  0x78   : > { %v343_v40 = vadd.f32 %v311_v26, %v245_v21  ;;  %v250_v43 = vld [vmem:[#allocation2 + $0xe0] sm:$0xff]  ;;  %369 = vst [vmem:[#allocation2 + $0x88] sm:$0xff] %v337_v31  ;;  %370 = vst [vmem:[#allocation2 + $0x90] sm:$0xff] %v338_v32  ;;  %v313_v45 = vmul.f32 %v1129_v13, %v280_v34  ;;  %v314_v46 = vmul.f32 %v1129_v13, %v281_v36  ;;  %v251_v49 = vld [vmem:[#allocation2 + $0xe8] sm:$0xff] }
  0x79   : > { %371 = vst [vmem:[#allocation2 + $0x98] sm:$0xff] %v339_v33  ;;  %v315_v47 = vmul.f32 %v1129_v13, %v282_v42  ;;  %v283_v48 = vld [vmem:[%s1108_s16 + $0xe0] sm:$0xff]  ;;  %v284_v50 = vld [vmem:[%s1108_s16 + $0xe8] sm:$0xff]  ;;  %372 = vst [vmem:[#allocation2 + $0xa0] sm:$0xff] %v340_v37  ;;  %v344_v54 = vadd.f32 %v312_v44, %v246_v27 }
  0x7a   : > { %373 = vst [vmem:[#allocation2 + $0xa8] sm:$0xff] %v341_v38  ;;  %374 = vst [vmem:[#allocation2 + $0xb0] sm:$0xff] %v342_v39  ;;  %v316_v51 = vmul.f32 %v1129_v13, %v283_v48  ;;  %v317_v52 = vmul.f32 %v1129_v13, %v284_v50  ;;  %v285_v53 = vld [vmem:[%s1108_s16 + $0xf0] sm:$0xff]  ;;  %v345_v55 = vadd.f32 %v313_v45, %v247_v29  ;;  %v253_v59 = vld [vmem:[#allocation2 + $0xf8] sm:$0xff]  ;;  %387 = sbr.rel (%p646_p10) target bundleno = 315 (0x13b), region = 36 }
  0x7b   : > { %375 = vst [vmem:[#allocation2 + $0xb8] sm:$0xff] %v343_v40  ;;  %v346_v56 = vadd.f32 %v314_v46, %v248_v35  ;;  %v347_v57 = vadd.f32 %v315_v47, %v249_v41  ;;  %v252_v58 = vld [vmem:[#allocation2 + $0xf0] sm:$0xff]  ;;  %v286_v60 = vld [vmem:[%s1108_s16 + $0xf8] sm:$0xff]  ;;  %v318_v63 = vmul.f32 %v1129_v13, %v285_v53  ;;  %376 = vst [vmem:[#allocation2 + $0xc0] sm:$0xff] %v344_v54 }
  0x7c   : > { %v348_v61 = vadd.f32 %v316_v51, %v250_v43  ;;  %v349_v62 = vadd.f32 %v317_v52, %v251_v49  ;;  %v319_v0 = vmul.f32 %v1129_v13, %v286_v60  ;;  %377 = vst [vmem:[#allocation2 + $0xc8] sm:$0xff] %v345_v55  ;;  %v389_v3 = vld [vmem:[#allocation2 + $0x8] sm:$0xff] (!%p646_p10)  ;;  %v388_v4 = vld [vmem:[#allocation2] sm:$0xff] (!%p646_p10)  ;;  %v391_v5 = vld [vmem:[#allocation2 + $0x18] sm:$0xff] (!%p646_p10) }
  0x7d   : > { %378 = vst [vmem:[#allocation2 + $0xd0] sm:$0xff] %v346_v56  ;;  %379 = vst [vmem:[#allocation2 + $0xd8] sm:$0xff] %v347_v57  ;;  %v350_v1 = vadd.f32 %v318_v63, %v252_v58  ;;  %452 = vxpose.xlu1.b32.start [1/16] (!%p646_p10), %v389_v3, 128  ;;  %420 = vxpose.xlu0.b32.start [1/16] (!%p646_p10), %v388_v4, 128  ;;  %v390_v6 = vld [vmem:[#allocation2 + $0x10] sm:$0xff] (!%p646_p10)  ;;  %v393_v13 = vld [vmem:[#allocation2 + $0x28] sm:$0xff] (!%p646_p10) }
  0x7e   : > { %380 = vst [vmem:[#allocation2 + $0xe0] sm:$0xff] %v348_v61  ;;  %381 = vst [vmem:[#allocation2 + $0xe8] sm:$0xff] %v349_v62  ;;  %v351_v2 = vadd.f32 %v319_v0, %v253_v59  ;;  %v392_v7 = vld [vmem:[#allocation2 + $0x20] sm:$0xff] (!%p646_p10)  ;;  %v395_v8 = vld [vmem:[#allocation2 + $0x38] sm:$0xff] (!%p646_p10) }
  0x7f   : > { %382 = vst [vmem:[#allocation2 + $0xf0] sm:$0xff] %v350_v1  ;;  %v394_v9 = vld [vmem:[#allocation2 + $0x30] sm:$0xff] (!%p646_p10)  ;;  %v397_v10 = vld [vmem:[#allocation2 + $0x48] sm:$0xff] (!%p646_p10)  ;;  %v396_v11 = vld [vmem:[#allocation2 + $0x40] sm:$0xff] (!%p646_p10) }
  0x80   : > { %383 = vst [vmem:[#allocation2 + $0xf8] sm:$0xff] %v351_v2  ;;  %v399_v12 = vld [vmem:[#allocation2 + $0x58] sm:$0xff] (!%p646_p10)  ;;  %v398_v14 = vld [vmem:[#allocation2 + $0x50] sm:$0xff] (!%p646_p10)  ;;  %v401_v15 = vld [vmem:[#allocation2 + $0x68] sm:$0xff] (!%p646_p10) }
  0x81   : > { %453 = vxpose.xlu1.b32.cont [2/16] %v391_v5, 128  ;;  %421 = vxpose.xlu0.b32.cont [2/16] %v390_v6, 128  ;;  %v400_v16 = vld [vmem:[#allocation2 + $0x60] sm:$0xff]  ;;  %v403_v17 = vld [vmem:[#allocation2 + $0x78] sm:$0xff]  ;;  %v402_v18 = vld [vmem:[#allocation2 + $0x70] sm:$0xff] }
  0x82   : > { %v405_v19 = vld [vmem:[#allocation2 + $0x88] sm:$0xff]  ;;  %v404_v20 = vld [vmem:[#allocation2 + $0x80] sm:$0xff]  ;;  %v407_v21 = vld [vmem:[#allocation2 + $0x98] sm:$0xff] }
  0x83   : > { %v406_v22 = vld [vmem:[#allocation2 + $0x90] sm:$0xff]  ;;  %v409_v23 = vld [vmem:[#allocation2 + $0xa8] sm:$0xff]  ;;  %v408_v24 = vld [vmem:[#allocation2 + $0xa0] sm:$0xff] }
  0x84   : > { %v411_v25 = vld [vmem:[#allocation2 + $0xb8] sm:$0xff]  ;;  %v410_v26 = vld [vmem:[#allocation2 + $0xb0] sm:$0xff]  ;;  %v413_v27 = vld [vmem:[#allocation2 + $0xc8] sm:$0xff] }
  0x85   : > { %454 = vxpose.xlu1.b32.cont [3/16] %v393_v13, 128  ;;  %422 = vxpose.xlu0.b32.cont [3/16] %v392_v7, 128  ;;  %v412_v28 = vld [vmem:[#allocation2 + $0xc0] sm:$0xff]  ;;  %v415_v29 = vld [vmem:[#allocation2 + $0xd8] sm:$0xff]  ;;  %v414_v30 = vld [vmem:[#allocation2 + $0xd0] sm:$0xff] }
  0x86   : > { %v417_v31 = vld [vmem:[#allocation2 + $0xe8] sm:$0xff]  ;;  %v416_v32 = vld [vmem:[#allocation2 + $0xe0] sm:$0xff]  ;;  %v418_v34 = vld [vmem:[#allocation2 + $0xf0] sm:$0xff] }
  0x87   : > { %v419_v33 = vld [vmem:[#allocation2 + $0xf8] sm:$0xff] }
  0x89   : > { %455 = vxpose.xlu1.b32.cont [4/16] %v395_v8, 128  ;;  %423 = vxpose.xlu0.b32.cont [4/16] %v394_v9, 128 }
  0x8d   : > { %456 = vxpose.xlu1.b32.cont [5/16] %v397_v10, 128  ;;  %424 = vxpose.xlu0.b32.cont [5/16] %v396_v11, 128 }
  0x91   : > { %457 = vxpose.xlu1.b32.cont [6/16] %v399_v12, 128  ;;  %425 = vxpose.xlu0.b32.cont [6/16] %v398_v14, 128 }
  0x95   : > { %458 = vxpose.xlu1.b32.cont [7/16] %v401_v15, 128  ;;  %426 = vxpose.xlu0.b32.cont [7/16] %v400_v16, 128 }
  0x99   : > { %459 = vxpose.xlu1.b32.cont [8/16] %v403_v17, 128  ;;  %427 = vxpose.xlu0.b32.cont [8/16] %v402_v18, 128 }
  0x9d   : > { %460 = vxpose.xlu1.b32.cont [9/16] %v405_v19, 128  ;;  %428 = vxpose.xlu0.b32.cont [9/16] %v404_v20, 128 }
  0xa1   : > { %461 = vxpose.xlu1.b32.cont [10/16] %v407_v21, 128  ;;  %429 = vxpose.xlu0.b32.cont [10/16] %v406_v22, 128 }
  0xa5   : > { %462 = vxpose.xlu1.b32.cont [11/16] %v409_v23, 128  ;;  %430 = vxpose.xlu0.b32.cont [11/16] %v408_v24, 128 }
  0xa9   : > { %463 = vxpose.xlu1.b32.cont [12/16] %v411_v25, 128  ;;  %431 = vxpose.xlu0.b32.cont [12/16] %v410_v26, 128 }
  0xad   : > { %464 = vxpose.xlu1.b32.cont [13/16] %v413_v27, 128  ;;  %432 = vxpose.xlu0.b32.cont [13/16] %v412_v28, 128 }
  0xb1   : > { %465 = vxpose.xlu1.b32.cont [14/16] %v415_v29, 128  ;;  %433 = vxpose.xlu0.b32.cont [14/16] %v414_v30, 128 }
  0xb5   : > { %466 = vxpose.xlu1.b32.cont [15/16] %v417_v31, 128  ;;  %434 = vxpose.xlu0.b32.cont [15/16] %v416_v32, 128 }
  0xb9   : > { %467 = vxpose.xlu1.b32.end [16/16] %v419_v33, 128  ;;  %435 = vxpose.xlu0.b32.end [16/16] %v418_v34, 128 }
  0xfd   : > { %v468_v35 = vpop.trf.xlu1  ;;  %v436_v36 = vpop.trf.xlu0 }
  0xfe   : > { %500 = vst [vmem:[%s1117_s6 + $0x80] sm:$0xff] %v468_v35  ;;  %484 = vst [vmem:[%s1117_s6] sm:$0xff] %v436_v36 }
 0x101   : > { %v469_v37 = vpop.trf.xlu1  ;;  %v437_v38 = vpop.trf.xlu0 }
 0x102   : > { %501 = vst [vmem:[%s1117_s6 + $0x88] sm:$0xff] %v469_v37  ;;  %485 = vst [vmem:[%s1117_s6 + $0x8] sm:$0xff] %v437_v38 }
 0x105   : > { %v470_v39 = vpop.trf.xlu1  ;;  %v438_v40 = vpop.trf.xlu0 }
 0x106   : > { %502 = vst [vmem:[%s1117_s6 + $0x90] sm:$0xff] %v470_v39  ;;  %486 = vst [vmem:[%s1117_s6 + $0x10] sm:$0xff] %v438_v40 }
 0x109   : > { %v471_v41 = vpop.trf.xlu1  ;;  %v439_v42 = vpop.trf.xlu0 }
 0x10a   : > { %503 = vst [vmem:[%s1117_s6 + $0x98] sm:$0xff] %v471_v41  ;;  %487 = vst [vmem:[%s1117_s6 + $0x18] sm:$0xff] %v439_v42 }
 0x10d   : > { %v472_v43 = vpop.trf.xlu1  ;;  %v440_v44 = vpop.trf.xlu0 }
 0x10e   : > { %504 = vst [vmem:[%s1117_s6 + $0xa0] sm:$0xff] %v472_v43  ;;  %488 = vst [vmem:[%s1117_s6 + $0x20] sm:$0xff] %v440_v44 }
 0x111   : > { %v473_v45 = vpop.trf.xlu1  ;;  %v441_v46 = vpop.trf.xlu0 }
 0x112   : > { %505 = vst [vmem:[%s1117_s6 + $0xa8] sm:$0xff] %v473_v45  ;;  %489 = vst [vmem:[%s1117_s6 + $0x28] sm:$0xff] %v441_v46 }
 0x115   : > { %v474_v47 = vpop.trf.xlu1  ;;  %v442_v48 = vpop.trf.xlu0 }
 0x116   : > { %506 = vst [vmem:[%s1117_s6 + $0xb0] sm:$0xff] %v474_v47  ;;  %490 = vst [vmem:[%s1117_s6 + $0x30] sm:$0xff] %v442_v48 }
 0x119   : > { %v475_v49 = vpop.trf.xlu1  ;;  %v443_v50 = vpop.trf.xlu0 }
 0x11a   : > { %507 = vst [vmem:[%s1117_s6 + $0xb8] sm:$0xff] %v475_v49  ;;  %491 = vst [vmem:[%s1117_s6 + $0x38] sm:$0xff] %v443_v50 }
 0x11d   : > { %v476_v51 = vpop.trf.xlu1  ;;  %v444_v52 = vpop.trf.xlu0 }
 0x11e   : > { %508 = vst [vmem:[%s1117_s6 + $0xc0] sm:$0xff] %v476_v51  ;;  %492 = vst [vmem:[%s1117_s6 + $0x40] sm:$0xff] %v444_v52 }
 0x121   : > { %v477_v53 = vpop.trf.xlu1  ;;  %v445_v54 = vpop.trf.xlu0 }
 0x122   : > { %509 = vst [vmem:[%s1117_s6 + $0xc8] sm:$0xff] %v477_v53  ;;  %493 = vst [vmem:[%s1117_s6 + $0x48] sm:$0xff] %v445_v54 }
 0x125   : > { %v478_v55 = vpop.trf.xlu1  ;;  %v446_v56 = vpop.trf.xlu0 }
 0x126   : > { %510 = vst [vmem:[%s1117_s6 + $0xd0] sm:$0xff] %v478_v55  ;;  %494 = vst [vmem:[%s1117_s6 + $0x50] sm:$0xff] %v446_v56 }
 0x129   : > { %v479_v57 = vpop.trf.xlu1  ;;  %v447_v58 = vpop.trf.xlu0 }
 0x12a   : > { %511 = vst [vmem:[%s1117_s6 + $0xd8] sm:$0xff] %v479_v57  ;;  %495 = vst [vmem:[%s1117_s6 + $0x58] sm:$0xff] %v447_v58 }
 0x12d   : > { %v480_v59 = vpop.trf.xlu1  ;;  %v448_v60 = vpop.trf.xlu0 }
 0x12e   : > { %512 = vst [vmem:[%s1117_s6 + $0xe0] sm:$0xff] %v480_v59  ;;  %496 = vst [vmem:[%s1117_s6 + $0x60] sm:$0xff] %v448_v60 }
 0x131   : > { %v481_v61 = vpop.trf.xlu1  ;;  %v449_v62 = vpop.trf.xlu0 }
 0x132   : > { %513 = vst [vmem:[%s1117_s6 + $0xe8] sm:$0xff] %v481_v61  ;;  %497 = vst [vmem:[%s1117_s6 + $0x68] sm:$0xff] %v449_v62 }
 0x135   : > { %v482_v63 = vpop.trf.xlu1  ;;  %v450_v0 = vpop.trf.xlu0 }
 0x136   : > { %514 = vst [vmem:[%s1117_s6 + $0xf0] sm:$0xff] %v482_v63  ;;  %498 = vst [vmem:[%s1117_s6 + $0x70] sm:$0xff] %v450_v0 }
 0x139   : > { %v483_v1 = vpop.trf.xlu1  ;;  %v451_v2 = vpop.trf.xlu0 }
 0x13a   : > { %515 = vst [vmem:[%s1117_s6 + $0xf8] sm:$0xff] %v483_v1  ;;  %499 = vst [vmem:[%s1117_s6 + $0x78] sm:$0xff] %v451_v2 }
 0x13b PF: > { %s652_s0 = sshll.u32 %s913_s25, 12  ;;  %s533_s7 = sshll.u32 %s1117_s6, 4  ;;  %s1227_s7 = int_to_ptr.vmem [resolvable:$true] %s533_s7 }
 0x13c   : > { %s1224_s11 = scalar_lea.hbm %s1294_s2, %s652_s0  ;;  %s1231_s18 = scalar_lea.sflag [#allocation7], %s180_s5 }
 0x13d   : > { %s801_s22 = scalar_lea.vmem %s1227_s7, 4096  ;;  %p1303_p7 = scmp.ne.s32.totalorder %s1300_s12, 0 }
 0x13e   : > { %p802_p5 = scmp.ne.s32.totalorder %s1227_s7, %s801_s22  ;;  %s932_s25 = smov [#allocation8]  }
 0x13f   : > { %s805_s29 = sshll.u32 %s932_s25, 4  ;;  %s806_s29 = int_to_ptr.vmem [resolvable:$false] %s805_s29 }
 0x140   : > { %p803_p3 = pnand %p802_p5, %p1303_p7  ;;  %s807_s10 = scalar_lea.vmem %s806_s29, 8192 }
 0x141   : > { %p808_p8 = scmp.lt.s32.totalorder %s1227_s7, %s806_s29  ;;  %p809_p9 = scmp.lt.s32.totalorder %s807_s10, %s801_s22 }
 0x142   : > { %p804_p4 = pneg %p803_p3 }
 0x143   : > { %p810_p12 = por %p809_p9, %p808_p8 }
 0x145   : > { %p811_p13 = pnand %p810_p12, %p804_p4 }
 0x147   : > { %814 = shalt.err (!%p811_p13)
}
 0x148   : > { %s815_s8 = scalar_lea.hbm %s1224_s11, 4096  ;;  %s819_s4 = scalar_lea.hbm %s1294_s2, 8192 }
 0x149   : > { %p816_p0 = scmp.ne.s32.totalorder %s1224_s11, %s815_s8  ;;  %p820_p2 = scmp.lt.u32.totalorder %s1224_s11, %s1294_s2 }
 0x14a   : > { %p821_p1 = scmp.lt.u32.totalorder %s819_s4, %s815_s8  ;;  %p823_p5 = scmp.lt.u32.totalorder %s815_s8, %s1224_s11 }
 0x14b   : > { %p817_p6 = pnand %p816_p0, %p1303_p7 }
 0x14c   : > { %p822_p10 = por %p821_p1, %p820_p2 }
 0x14d   : > { %p818_p11 = pneg %p817_p6 }
 0x14e   : > { %p824_p3 = por %p823_p5, %p822_p10 }
 0x150   : > { %p825_p4 = pnand %p824_p3, %p818_p11 }
 0x152   : > { %828 = shalt.err (!%p825_p4)
}
 0x153   : > { %s933_s0 = smov 128   ;;  %s934_s17 = smov 8  }
 0x154   : > { %655 = dma.vmem_to_hbm [thread:$0]  (%p1303_p7), %s1227_s7, 4096, %s1224_s11, %s1231_s18, %s933_s0, %s933_s0, %s934_s17  }
 0x155 PF: > { %p666_p8 = scmp.ge.s32.totalorder %s925_s28, 2  ;;  %s548_s30 = sand.u32 1, %s885_s19  }
 0x156   : > { %p1304_p9 = scmp.ne.s32.totalorder %s1301_s15, 0  ;;  %s549_s22 = scalar_lea.sflag [#allocation7], %s548_s30 }
 0x158   : > { %p662_p12 = pnand %p666_p8, %p1304_p9 }
 0x15a   : > { %880 = dma.done.wait (!%p662_p12), %s549_s22, 4096  }
 0x15b   : > { %882 = vsyncadd (!%p662_p12), %s549_s22, 4294963200  ;;  %s22_s28 = sadd.s32 1, %s925_s28   ;;  %s1305_s12 = sld [smem:[#allocation12_spill]] }
 0x15c   : > { %p19_p13 = scmp.ge.s32.totalorder %s22_s28, 50   ;;  %s1306_s19 = smov %s889_s20 }
 0x15d   : > { %s1307_s20 = smov %s893_s21  ;;  %s1308_s21 = smov %s1049_s13 }
 0x15e   : > { %s1309_s22 = smov %s901_s23  ;;  %s1310_s23 = smov %s905_s24 }
 0x15f   : > { %s1311_s24 = smov %s1052_s14  ;;  %s1312_s0 = smov %s917_s26 }
 0x160   : > { %s1313_s25 = smov %s921_s27  ;;  %s1314_s26 = smov %s1317_s3 }
 0x161   : > { %s1315_s27 = smov %s1305_s12  ;;  %21 = sbr.rel (!%p19_p13) target bundleno = 21 (0x15), region = 77 }
 0x168   :  { %554 = vsyncpa [#allocation6], 1 }
 0x169   :  { %556 = vsyncpa [#allocation6 + $0x1], 1 }
 0x16a   :  { %557 = vsyncpa [#allocation7], 1 }
 0x16b   :  { %559 = vsyncpa [#allocation7 + $0x1], 1 }

</bundles_post_ra>
